<compile_context>
chip_gen: v5e
topology: v5e:2x2
jax: 0.10.0
libtpu: 0.0.40
codegen_flags: <defaults>
</compile_context>

<pallas_src>
import jax
import jax.numpy as jnp
from jax.experimental import pallas as pl
from jax.experimental.pallas import tpu as pltpu


# ----------------------------- Pallas kernel ------------------------------

def _gm_kernel(x1_ref, x2_ref, w1a_ref, w1b_ref, b1_ref, w2_ref, b2_ref, o_ref):
    """Fused gate MLP on one (TB, C, THW) activation block (native NCHW view).

    For each batch slice b in the block:
        h = relu(W1a @ x1[b] + W1b @ x2[b] + b1)     # (hidden, THW)
        o = sigmoid(W2 @ h + b2)                     # (C, THW)
    """
    w1a = w1a_ref[...]
    w1b = w1b_ref[...]
    b1 = b1_ref[...]
    w2 = w2_ref[...]
    b2 = b2_ref[...]

    tb = x1_ref.shape[0]                      # static, small -> unrolled loop
    for b in range(tb):
        h = (jnp.dot(w1a, x1_ref[b], preferred_element_type=jnp.float32)
             + jnp.dot(w1b, x2_ref[b], preferred_element_type=jnp.float32)
             + b1)
        h = jnp.maximum(h, 0.0)                                    # ReLU (VPU)
        o = jnp.dot(w2, h, preferred_element_type=jnp.float32) + b2
        o_ref[b] = jax.nn.sigmoid(o).astype(o_ref.dtype)           # EUP sigmoid


# ------------------------------- wrapper -----------------------------------

def gm_forward(x1_nchw, x2_nchw, params, *, target_block_lanes=16384, max_tb=8):
    """GM.forward: returns gated weights, shape (B, C, H, W)."""
    B, C, H, W = x1_nchw.shape
    HW = H * W
    w1, b1, w2, b2 = params          # w1:(hid, 2C) b1:(hid,) w2:(C, hid) b2:(C,)
    hidden = w1.shape[0]

    # Free reshapes (no transpose, no pad, no extra HBM traffic).
    x1v = x1_nchw.reshape(B, C, HW)
    x2v = x2_nchw.reshape(B, C, HW)

    # Block sizing: aim for ~0.5-2 MiB f32 input blocks so each grid step's DMA
    # dwarfs the fixed per-step overhead.
    if HW > target_block_lanes:
        assert target_block_lanes % 128 == 0
        thw = target_block_lanes          # lane-dense HW tile (mult of 128)
        tb = 1
    else:
        thw = HW                          # full HW dim (always legal)
        tb = min(B, max_tb, max(1, target_block_lanes // max(HW, 1)))
        while B % tb != 0:                # keep batch blocks exact
            tb -= 1

    # Split W1 into the x1 / x2 halves (torch.cat((x1, x2), dim=2) ordering).
    w1a = w1[:, :C]
    w1b = w1[:, C:]
    b1c = b1.reshape(hidden, 1)
    b2c = b2.reshape(C, 1)

    grid = (B // tb, pl.cdiv(HW, thw))

    cost = pl.CostEstimate(
        flops=6 * B * HW * C * hidden,                 # two small matmuls / pixel
        transcendentals=B * HW * C,                    # sigmoid
        bytes_accessed=3 * B * C * HW * 4
        + 4 * (w1.size + b1.size + w2.size + b2.size),
    )

    out = pl.pallas_call(
        _gm_kernel,
        out_shape=jax.ShapeDtypeStruct((B, C, HW), jnp.float32),
        grid=grid,
        in_specs=[
            pl.BlockSpec((tb, C, thw), lambda bi, hi: (bi, 0, hi)),  # x1 (streams)
            pl.BlockSpec((tb, C, thw), lambda bi, hi: (bi, 0, hi)),  # x2 (streams)
            pl.BlockSpec((hidden, C), lambda bi, hi: (0, 0)),        # W1a (resident)
            pl.BlockSpec((hidden, C), lambda bi, hi: (0, 0)),        # W1b (resident)
            pl.BlockSpec((hidden, 1), lambda bi, hi: (0, 0)),        # b1  (resident)
            pl.BlockSpec((C, hidden), lambda bi, hi: (0, 0)),        # W2  (resident)
            pl.BlockSpec((C, 1), lambda bi, hi: (0, 0)),             # b2  (resident)
        ],
        out_specs=pl.BlockSpec((tb, C, thw), lambda bi, hi: (bi, 0, hi)),
        compiler_params=pltpu.CompilerParams(
            dimension_semantics=("parallel", "parallel"),   # megacore on v7x
            vmem_limit_bytes=32 * 1024 * 1024,              # v5e default is 16 MiB
        ),
        cost_estimate=cost,
    )(x1v, x2v, w1a, w1b, b1c, w2, b2c)

    return out.reshape(B, C, H, W)       # free reshape back to NCHW


# ----------------------------- params / reference --------------------------

def init_gm_params(key, dim):
    """GM.__init__: Linear(2*dim, dim//4) -> ReLU -> Linear(dim//4, dim) -> Sigmoid.
    Weights trunc_normal(std=0.02), biases zero (GM._init_weights)."""
    hidden = dim // 4
    kw1, kw2 = jax.random.split(key, 2)
    w1 = 0.02 * jax.random.truncated_normal(kw1, -2.0, 2.0, (hidden, 2 * dim),
                                            jnp.float32)
    b1 = jnp.zeros((hidden,), jnp.float32)
    w2 = 0.02 * jax.random.truncated_normal(kw2, -2.0, 2.0, (dim, hidden),
                                            jnp.float32)
    b2 = jnp.zeros((dim,), jnp.float32)
    return (w1, b1, w2, b2)


def gm_reference(x1, x2, params):
    """Pure-JAX reference mirroring the PyTorch forward (correctness check)."""
    B, C, H, W = x1.shape
    w1, b1, w2, b2 = params
    x1f = x1.reshape(B, C, H * W).transpose(0, 2, 1)           # (B, HW, C)
    x2f = x2.reshape(B, C, H * W).transpose(0, 2, 1)
    xin = jnp.concatenate([x1f, x2f], axis=2)                  # (B, HW, 2C)
    h = jnp.maximum(xin @ w1.T + b1, 0.0)
    g = jax.nn.sigmoid(h @ w2.T + b2)                          # (B, HW, C)
    return g.reshape(B, H, W, C).transpose(0, 3, 1, 2)         # (B, C, H, W)


# --------------------------------- main -------------------------------------

if __name__ == "__main__":
    dim = 16              # GM(dim=16): Linear(32->4) -> ReLU -> Linear(4->16) -> Sigmoid
    B, H, W = 2, 16, 16

    key = jax.random.PRNGKey(0)
    k1, k2, kp = jax.random.split(key, 3)
    x1 = jax.random.normal(k1, (B, dim, H, W), jnp.float32)
    x2 = jax.random.normal(k2, (B, dim, H, W), jnp.float32)
    params = init_gm_params(kp, dim)

    out = gm_forward(x1, x2, params)
    out = jax.block_until_ready(out)

    assert out.shape == (B, dim, H, W)
    assert out.dtype == jnp.float32
    assert bool(jnp.all(jnp.isfinite(out)))
    assert bool(jnp.all((out >= 0.0) & (out <= 1.0)))          # sigmoid range

    ref = gm_reference(x1, x2, params)
    assert bool(jnp.allclose(out, ref, atol=1e-4, rtol=1e-4))

    print("KERNEL_OK")
</pallas_src>

<mosaic_0001>
module attributes {stable_mosaic.version = 11 : i64} {
  func.func @_gm_kernel(%arg0: i32, %arg1: i32, %arg2: memref<2x16x256xf32, #tpu.memory_space<vmem>>, %arg3: memref<2x16x256xf32, #tpu.memory_space<vmem>>, %arg4: memref<4x16xf32, #tpu.memory_space<vmem>>, %arg5: memref<4x16xf32, #tpu.memory_space<vmem>>, %arg6: memref<4x1xf32, #tpu.memory_space<vmem>>, %arg7: memref<16x4xf32, #tpu.memory_space<vmem>>, %arg8: memref<16x1xf32, #tpu.memory_space<vmem>>, %arg9: memref<2x16x256xf32, #tpu.memory_space<vmem>>) attributes {dimension_semantics = [#tpu.dimension_semantics<parallel>, #tpu.dimension_semantics<parallel>], iteration_bounds = array<i64: 1, 1>, scalar_prefetch = 0 : i64, scratch_operands = 0 : i64, tpu.core_type = #tpu.core_type<tc>, window_params = [{transform_indices = @transform_0, window_bounds = array<i64: 2, 16, 256>}, {transform_indices = @transform_1, window_bounds = array<i64: 2, 16, 256>}, {pipeline_mode = #tpu.pipeline_mode<synchronous>, transform_indices = @transform_2, window_bounds = array<i64: 4, 16>}, {pipeline_mode = #tpu.pipeline_mode<synchronous>, transform_indices = @transform_3, window_bounds = array<i64: 4, 16>}, {pipeline_mode = #tpu.pipeline_mode<synchronous>, transform_indices = @transform_4, window_bounds = array<i64: 4, 1>}, {pipeline_mode = #tpu.pipeline_mode<synchronous>, transform_indices = @transform_5, window_bounds = array<i64: 16, 4>}, {pipeline_mode = #tpu.pipeline_mode<synchronous>, transform_indices = @transform_6, window_bounds = array<i64: 16, 1>}, {transform_indices = @transform_7, window_bounds = array<i64: 2, 16, 256>}]} {
    %c0 = arith.constant 0 : index
    %c0_0 = arith.constant 0 : index
    %0 = vector.load %arg4[%c0, %c0_0] : memref<4x16xf32, #tpu.memory_space<vmem>>, vector<4x16xf32>
    %c0_1 = arith.constant 0 : index
    %c0_2 = arith.constant 0 : index
    %1 = vector.load %arg5[%c0_1, %c0_2] : memref<4x16xf32, #tpu.memory_space<vmem>>, vector<4x16xf32>
    %c0_3 = arith.constant 0 : index
    %c0_4 = arith.constant 0 : index
    %2 = vector.load %arg6[%c0_3, %c0_4] : memref<4x1xf32, #tpu.memory_space<vmem>>, vector<4x1xf32>
    %c0_5 = arith.constant 0 : index
    %c0_6 = arith.constant 0 : index
    %3 = vector.load %arg7[%c0_5, %c0_6] : memref<16x4xf32, #tpu.memory_space<vmem>>, vector<16x4xf32>
    %c0_7 = arith.constant 0 : index
    %c0_8 = arith.constant 0 : index
    %4 = vector.load %arg8[%c0_7, %c0_8] : memref<16x1xf32, #tpu.memory_space<vmem>>, vector<16x1xf32>
    %c0_9 = arith.constant 0 : index
    %c0_10 = arith.constant 0 : index
    %c0_11 = arith.constant 0 : index
    %5 = vector.load %arg2[%c0_9, %c0_10, %c0_11] : memref<2x16x256xf32, #tpu.memory_space<vmem>>, vector<1x16x256xf32>
    %6 = vector.shape_cast %5 : vector<1x16x256xf32> to vector<16x256xf32>
    %cst = arith.constant dense<0.000000e+00> : vector<4x256xf32>
    %7 = tpu.matmul %0, %6, %cst {dimension_numbers = #tpu.dot_dimension_numbers<[1], [0], [0], [1], [0, 0, 1, 1], [], []>} : vector<4x16xf32>, vector<16x256xf32>, vector<4x256xf32> -> vector<4x256xf32>
    %c0_12 = arith.constant 0 : index
    %c0_13 = arith.constant 0 : index
    %c0_14 = arith.constant 0 : index
    %8 = vector.load %arg3[%c0_12, %c0_13, %c0_14] : memref<2x16x256xf32, #tpu.memory_space<vmem>>, vector<1x16x256xf32>
    %9 = vector.shape_cast %8 : vector<1x16x256xf32> to vector<16x256xf32>
    %cst_15 = arith.constant dense<0.000000e+00> : vector<4x256xf32>
    %10 = tpu.matmul %1, %9, %cst_15 {dimension_numbers = #tpu.dot_dimension_numbers<[1], [0], [0], [1], [0, 0, 1, 1], [], []>} : vector<4x16xf32>, vector<16x256xf32>, vector<4x256xf32> -> vector<4x256xf32>
    %11 = arith.addf %7, %10 : vector<4x256xf32>
    %12 = vector.broadcast %2 : vector<4x1xf32> to vector<4x256xf32>
    %13 = arith.addf %11, %12 : vector<4x256xf32>
    %cst_16 = arith.constant 0.000000e+00 : f32
    %14 = vector.broadcast %cst_16 : f32 to vector<4x256xf32>
    %15 = arith.maximumf %13, %14 : vector<4x256xf32>
    %cst_17 = arith.constant dense<0.000000e+00> : vector<16x256xf32>
    %16 = tpu.matmul %3, %15, %cst_17 {dimension_numbers = #tpu.dot_dimension_numbers<[1], [0], [0], [1], [0, 0, 1, 1], [], []>} : vector<16x4xf32>, vector<4x256xf32>, vector<16x256xf32> -> vector<16x256xf32>
    %17 = vector.broadcast %4 : vector<16x1xf32> to vector<16x256xf32>
    %18 = arith.addf %16, %17 : vector<16x256xf32>
    %19 = arith.negf %18 : vector<16x256xf32>
    %20 = math.exp %19 : vector<16x256xf32>
    %cst_18 = arith.constant 1.000000e+00 : f32
    %21 = vector.broadcast %cst_18 : f32 to vector<16x256xf32>
    %22 = arith.addf %21, %20 : vector<16x256xf32>
    %23 = arith.divf %21, %22 : vector<16x256xf32>
    %c0_19 = arith.constant 0 : index
    %c0_20 = arith.constant 0 : index
    %c0_21 = arith.constant 0 : index
    %24 = vector.load %arg9[%c0_19, %c0_20, %c0_21] : memref<2x16x256xf32, #tpu.memory_space<vmem>>, vector<1x16x256xf32>
    %25 = vector.shape_cast %24 : vector<1x16x256xf32> to vector<16x256xf32>
    %26 = vector.shape_cast %23 : vector<16x256xf32> to vector<1x16x256xf32>
    tpu.vector_store %arg9[%c0_19, %c0_20, %c0_21], %26 {strides = array<i32>} : memref<2x16x256xf32, #tpu.memory_space<vmem>>, vector<1x16x256xf32>,
    %c1 = arith.constant 1 : index
    %c0_22 = arith.constant 0 : index
    %c0_23 = arith.constant 0 : index
    %27 = vector.load %arg2[%c1, %c0_22, %c0_23] : memref<2x16x256xf32, #tpu.memory_space<vmem>>, vector<1x16x256xf32>
    %28 = vector.shape_cast %27 : vector<1x16x256xf32> to vector<16x256xf32>
    %cst_24 = arith.constant dense<0.000000e+00> : vector<4x256xf32>
    %29 = tpu.matmul %0, %28, %cst_24 {dimension_numbers = #tpu.dot_dimension_numbers<[1], [0], [0], [1], [0, 0, 1, 1], [], []>} : vector<4x16xf32>, vector<16x256xf32>, vector<4x256xf32> -> vector<4x256xf32>
    %c1_25 = arith.constant 1 : index
    %c0_26 = arith.constant 0 : index
    %c0_27 = arith.constant 0 : index
    %30 = vector.load %arg3[%c1_25, %c0_26, %c0_27] : memref<2x16x256xf32, #tpu.memory_space<vmem>>, vector<1x16x256xf32>
    %31 = vector.shape_cast %30 : vector<1x16x256xf32> to vector<16x256xf32>
    %cst_28 = arith.constant dense<0.000000e+00> : vector<4x256xf32>
    %32 = tpu.matmul %1, %31, %cst_28 {dimension_numbers = #tpu.dot_dimension_numbers<[1], [0], [0], [1], [0, 0, 1, 1], [], []>} : vector<4x16xf32>, vector<16x256xf32>, vector<4x256xf32> -> vector<4x256xf32>
    %33 = arith.addf %29, %32 : vector<4x256xf32>
    %34 = vector.broadcast %2 : vector<4x1xf32> to vector<4x256xf32>
    %35 = arith.addf %33, %34 : vector<4x256xf32>
    %cst_29 = arith.constant 0.000000e+00 : f32
    %36 = vector.broadcast %cst_29 : f32 to vector<4x256xf32>
    %37 = arith.maximumf %35, %36 : vector<4x256xf32>
    %cst_30 = arith.constant dense<0.000000e+00> : vector<16x256xf32>
    %38 = tpu.matmul %3, %37, %cst_30 {dimension_numbers = #tpu.dot_dimension_numbers<[1], [0], [0], [1], [0, 0, 1, 1], [], []>} : vector<16x4xf32>, vector<4x256xf32>, vector<16x256xf32> -> vector<16x256xf32>
    %39 = vector.broadcast %4 : vector<16x1xf32> to vector<16x256xf32>
    %40 = arith.addf %38, %39 : vector<16x256xf32>
    %41 = arith.negf %40 : vector<16x256xf32>
    %42 = math.exp %41 : vector<16x256xf32>
    %cst_31 = arith.constant 1.000000e+00 : f32
    %43 = vector.broadcast %cst_31 : f32 to vector<16x256xf32>
    %44 = arith.addf %43, %42 : vector<16x256xf32>
    %45 = arith.divf %43, %44 : vector<16x256xf32>
    %c1_32 = arith.constant 1 : index
    %c0_33 = arith.constant 0 : index
    %c0_34 = arith.constant 0 : index
    %46 = vector.load %arg9[%c1_32, %c0_33, %c0_34] : memref<2x16x256xf32, #tpu.memory_space<vmem>>, vector<1x16x256xf32>
    %47 = vector.shape_cast %46 : vector<1x16x256xf32> to vector<16x256xf32>
    %48 = vector.shape_cast %45 : vector<16x256xf32> to vector<1x16x256xf32>
    tpu.vector_store %arg9[%c1_32, %c0_33, %c0_34], %48 {strides = array<i32>} : memref<2x16x256xf32, #tpu.memory_space<vmem>>, vector<1x16x256xf32>,
    return
  }
  func.func @transform_0(%arg0: i32, %arg1: i32) -> (i32, i32, i32) {
    %c0_i32 = arith.constant 0 : i32
    %c0_i32_0 = arith.constant 0 : i32
    return %arg0, %c0_i32, %arg1 : i32, i32, i32
  }
  func.func @transform_1(%arg0: i32, %arg1: i32) -> (i32, i32, i32) {
    %c0_i32 = arith.constant 0 : i32
    %c0_i32_0 = arith.constant 0 : i32
    return %arg0, %c0_i32, %arg1 : i32, i32, i32
  }
  func.func @transform_2(%arg0: i32, %arg1: i32) -> (i32, i32) {
    %c0_i32 = arith.constant 0 : i32
    %c0_i32_0 = arith.constant 0 : i32
    %c0_i32_1 = arith.constant 0 : i32
    return %c0_i32, %c0_i32_0 : i32, i32
  }
  func.func @transform_3(%arg0: i32, %arg1: i32) -> (i32, i32) {
    %c0_i32 = arith.constant 0 : i32
    %c0_i32_0 = arith.constant 0 : i32
    %c0_i32_1 = arith.constant 0 : i32
    return %c0_i32, %c0_i32_0 : i32, i32
  }
  func.func @transform_4(%arg0: i32, %arg1: i32) -> (i32, i32) {
    %c0_i32 = arith.constant 0 : i32
    %c0_i32_0 = arith.constant 0 : i32
    %c0_i32_1 = arith.constant 0 : i32
    return %c0_i32, %c0_i32_0 : i32, i32
  }
  func.func @transform_5(%arg0: i32, %arg1: i32) -> (i32, i32) {
    %c0_i32 = arith.constant 0 : i32
    %c0_i32_0 = arith.constant 0 : i32
    %c0_i32_1 = arith.constant 0 : i32
    return %c0_i32, %c0_i32_0 : i32, i32
  }
  func.func @transform_6(%arg0: i32, %arg1: i32) -> (i32, i32) {
    %c0_i32 = arith.constant 0 : i32
    %c0_i32_0 = arith.constant 0 : i32
    %c0_i32_1 = arith.constant 0 : i32
    return %c0_i32, %c0_i32_0 : i32, i32
  }
  func.func @transform_7(%arg0: i32, %arg1: i32) -> (i32, i32, i32) {
    %c0_i32 = arith.constant 0 : i32
    %c0_i32_0 = arith.constant 0 : i32
    return %arg0, %c0_i32, %arg1 : i32, i32, i32
  }
}

</mosaic_0001>

<bundles_post_ra>
// kernel: tpu_custom_call.1
= control target key start
LH: loop header
LB: loop body
LE: loop exit
PB: predicated region body
PF: predicated region fallthrough
CT: control target
= control target key end

     0   :  { %12 = vsyncpa [#allocation3], 0  ;;  %s847_s0 = inlined_call_operand.hbm [shape: f32[2,16,256], index: 0, kind: input, shape index: {}]   ;;  %s848_s1 = inlined_call_operand.hbm [shape: f32[2,16,256], index: 1, kind: input, shape index: {}]   ;;  %s849_s2 = inlined_call_operand.vmem [shape: f32[4,16], index: 2, kind: input, shape index: {}]   ;;  %s850_s3 = inlined_call_operand.vmem [shape: f32[4,16], index: 3, kind: input, shape index: {}]   ;;  %s851_s4 = inlined_call_operand.vmem [shape: f32[4,1], index: 4, kind: input, shape index: {}]   ;;  %s852_s5 = inlined_call_operand.vmem [shape: f32[16,4], index: 5, kind: input, shape index: {}]   ;;  %s853_s6 = inlined_call_operand.vmem [shape: f32[16,1], index: 6, kind: input, shape index: {}]   ;;  %s854_s7 = inlined_call_operand.hbm [shape: f32[2,16,256], index: 7, kind: output, shape index: {}]  }
   0x1   :  { %13 = vsyncpa [#allocation6], 0 }
   0x2   :  { %14 = vsyncpa [#allocation4], 0  ;;  %s19_s26 = sshll.u32 %s847_s0, 4  ;;  %s713_s27 = smov [#allocation2]   ;;  %s20_s26 = int_to_ptr.hbm [resolvable:$true] %s19_s26 }
   0x3   :  { %s21_s28 = sshll.u32 %s713_s27, 4  ;;  %s32_s8 = sshll.u32 %s848_s1, 4  ;;  %s22_s28 = int_to_ptr.vmem [resolvable:$true] %s21_s28  ;;  %s33_s8 = int_to_ptr.hbm [resolvable:$true] %s32_s8 }
   0x4   :  { %s714_s9 = smov 256   ;;  %s715_s10 = smov 16  }
   0x5   :  { %27 = dma.hbm_to_vmem [thread:$0]  %s20_s26, 1024, %s22_s28, [#allocation3], %s714_s9, %s714_s9, %s715_s10  }
   0x6   :  { %s716_s11 = smov [#allocation5]  }
   0x7   :  { %s34_s12 = sshll.u32 %s716_s11, 4  ;;  %s35_s12 = int_to_ptr.vmem [resolvable:$true] %s34_s12 }
   0x8   :  { %40 = dma.hbm_to_vmem [thread:$0]  %s33_s8, 1024, %s35_s12, [#allocation6], %s714_s9, %s714_s9, %s715_s10  }
   0x9   :  { %707 = dma.done.wait [#allocation3], 1024  }
   0xa   :  { %708 = vsyncadd [#allocation3], 4294966272 }
   0xb   :  { %709 = dma.done.wait [#allocation6], 1024  }
   0xc   :  { %710 = vsyncadd [#allocation6], 4294966272  ;;  %v717_v0 = vmov 0   ;;  %v72_v1 = vld [vmem:[#allocation5 + $0x10] sm:$0xff]  ;;  %v73_v2 = vld [vmem:[#allocation5 + $0x18] sm:$0xff]  ;;  %vm74_vm0 = vcmask 130048  }
   0xd   :  { %601 = vset.pattern.permute.xlu0 %v717_v0  ;;  %602 = vset.pattern.permute.xlu1 %v717_v0  ;;  %v70_v3 = vld [vmem:[#allocation5] sm:$0xff]  ;;  %v71_v4 = vld [vmem:[#allocation5 + $0x8] sm:$0xff]  ;;  %v68_v6 = vld [vmem:[#allocation2 + $0x10] sm:$0xff]  ;;  %vm187_vm1 = vcmask 1043456   ;;  %vm180_vm2 = vcmask 31744   ;;  %s553_s24 = sshll.u32 %s854_s7, 4  ;;  %s554_s24 = int_to_ptr.hbm [resolvable:$true] %s553_s24 }
   0xe   :  { %92 = vmatpush.msra.mxu2 %v72_v1  ;;  %112 = vmatpush.msra.mxu3 %v73_v2  ;;  %v60_v5 = vld [vmem:[%s850_s3] sm:$0xf]  ;;  %v69_v7 = vld [vmem:[#allocation2 + $0x18] sm:$0xff]  ;;  %v67_v9 = vld [vmem:[#allocation2 + $0x8] sm:$0xff] }
   0xf   :  { %v66_v8 = vld [vmem:[#allocation2] sm:$0xff]  ;;  %v328_v10 = vld [vmem:[#allocation5 + $0x30] sm:$0xff]  ;;  %v329_v11 = vld [vmem:[#allocation5 + $0x38] sm:$0xff] }
  0x10   :  { %93 = vmatpush.msra.mxu2 %v70_v3  ;;  %113 = vmatpush.msra.mxu3 %v71_v4  ;;  %v61_v12 = vld [vmem:[%s851_s4] sm:$0xf]  ;;  %v327_v14 = vld [vmem:[#allocation5 + $0x28] sm:$0xff]  ;;  %v323_v16 = vld [vmem:[#allocation2 + $0x30] sm:$0xff] }
  0x11   :  { %567 = vmatmul.msk.f32.vlgmr.msra.gmra.mxu2 %vm74_vm0, %v60_v5  ;;  %568 = vmatmul.msk.f32.vlgmr.msra.gmra.mxu3 %vm74_vm0, %v60_v5  ;;  %v326_v13 = vld [vmem:[#allocation5 + $0x20] sm:$0xff]  ;;  %v324_v17 = vld [vmem:[#allocation2 + $0x38] sm:$0xff]  ;;  %v322_v19 = vld [vmem:[#allocation2 + $0x28] sm:$0xff] }
  0x12   :  { %135 = vmatpush.msrb.mxu2 %v68_v6  ;;  %155 = vmatpush.msrb.mxu3 %v69_v7  ;;  %v59_v15 = vld [vmem:[%s849_s2] sm:$0xf]  ;;  %v65_v23 = vld [vmem:[%s853_s6 + $0x8] sm:$0xff] }
  0x13   :  { %163 = vperm.xlu0 %601, %v61_v12   ;;  %v321_v18 = vld [vmem:[#allocation2 + $0x20] sm:$0xff]  ;;  %177 = vperm.xlu1 %602, %v65_v23   ;;  %v63_v36 = vld [vmem:[%s852_s5 + $0x8] sm:$0xff] }
  0x14   :  { %136 = vmatpush.msrb.mxu2 %v66_v8  ;;  %156 = vmatpush.msrb.mxu3 %v67_v9  ;;  %v64_v20 = vld [vmem:[%s853_s6] sm:$0xff] }
  0x15   :  { %v62_v33 = vld [vmem:[%s852_s5] sm:$0xff]  ;;  %s718_s5 = smov [#allocation7]  }
  0x16   :  { %344 = vmatpush.msra.mxu2 %v328_v10  ;;  %364 = vmatpush.msra.mxu3 %v329_v11  ;;  %s551_s21 = sshll.u32 %s718_s5, 4  ;;  %s552_s21 = int_to_ptr.vmem [resolvable:$true] %s551_s21 }
  0x18   :  { %345 = vmatpush.msra.mxu2 %v326_v13  ;;  %365 = vmatpush.msra.mxu3 %v327_v14 }
  0x19   :  { %569 = vmatmul.msk.f32.vlgmr.msrb.gmra.mxu2 %vm74_vm0, %v59_v15  ;;  %570 = vmatmul.msk.f32.vlgmr.msrb.gmra.mxu3 %vm74_vm0, %v59_v15 }
  0x1a   :  { %384 = vmatpush.msrb.mxu2 %v323_v16  ;;  %404 = vmatpush.msrb.mxu3 %v324_v17 }
  0x1b   :  { %172 = vperm.xlu0 %601, %v64_v20  }
  0x1c   :  { %385 = vmatpush.msrb.mxu2 %v321_v18  ;;  %405 = vmatpush.msrb.mxu3 %v322_v19 }
  0x21   :  { %581 = vmatmul.msk.f32.vlgmr.msra.gmra.mxu2 %vm74_vm0, %v60_v5  ;;  %582 = vmatmul.msk.f32.vlgmr.msra.gmra.mxu3 %vm74_vm0, %v60_v5 }
  0x29   :  { %583 = vmatmul.msk.f32.vlgmr.msrb.gmra.mxu2 %vm74_vm0, %v59_v15  ;;  %584 = vmatmul.msk.f32.vlgmr.msrb.gmra.mxu3 %vm74_vm0, %v59_v15 }
  0x85   :  { %v164_v28 = vpop.permute.xlu0 %163  ;;  %v178_v52 = vpop.permute.xlu1 %177 }
  0x8d   :  { %v173_v45 = vpop.permute.xlu0 %172 }
  0x94   :  { %v95_v21 = vpop.f32.mrf.mxu2  ;;  %v115_v22 = vpop.f32.mrf.mxu3 }
  0x9c   :  { %v138_v24 = vpop.f32.mrf.mxu2  ;;  %v158_v25 = vpop.f32.mrf.mxu3 }
  0x9d   :  { %v139_v26 = vadd.f32 %v138_v24, %v95_v21  ;;  %v159_v27 = vadd.f32 %v158_v25, %v115_v22 }
  0x9f   :  { %v166_v29 = vadd.f32 %v164_v28, %v139_v26  ;;  %v167_v30 = vadd.f32 %v164_v28, %v159_v27 }
  0xa1   :  { %v168_v31 = vmax.f32 %v166_v29, 0.0  ;;  %v169_v32 = vmax.f32 %v167_v30, 0.0 }
  0xa3   :  { %571 = vmatpush.msk.msra.mxu0 %vm187_vm1, %v168_v31  ;;  %574 = vmatpush.msk.msra.mxu1 %vm187_vm1, %v169_v32 }
  0xa4   :  { %572 = vmatmul.msk.f32.vlgmr.msra.gmra.mxu0 %vm180_vm2, %v62_v33  ;;  %575 = vmatmul.msk.f32.vlgmr.msra.gmra.mxu1 %vm180_vm2, %v62_v33  ;;  %v347_v34 = vpop.f32.mrf.mxu2  ;;  %v367_v35 = vpop.f32.mrf.mxu3 }
  0xac   :  { %573 = vmatmul.msk.f32.gmra.mxu0 %vm180_vm2, %v63_v36  ;;  %576 = vmatmul.msk.f32.gmra.mxu1 %vm180_vm2, %v63_v36  ;;  %v387_v37 = vpop.f32.mrf.mxu2  ;;  %v407_v38 = vpop.f32.mrf.mxu3 }
  0xad   :  { %v388_v39 = vadd.f32 %v387_v37, %v347_v34  ;;  %v408_v40 = vadd.f32 %v407_v38, %v367_v35 }
  0xaf   :  { %v410_v41 = vadd.f32 %v388_v39, %v164_v28  ;;  %v411_v42 = vadd.f32 %v408_v40, %v164_v28 }
  0xb1   :  { %v412_v43 = vmax.f32 %v410_v41, 0.0  ;;  %v413_v44 = vmax.f32 %v411_v42, 0.0 }
  0xb3   :  { %585 = vmatpush.msk.msrb.mxu0 %vm187_vm1, %v412_v43  ;;  %588 = vmatpush.msk.msrb.mxu1 %vm187_vm1, %v413_v44 }
  0xb4   :  { %586 = vmatmul.msk.f32.vlgmr.msrb.gmra.mxu0 %vm180_vm2, %v62_v33  ;;  %589 = vmatmul.msk.f32.vlgmr.msrb.gmra.mxu1 %vm180_vm2, %v62_v33 }
  0xbc   :  { %587 = vmatmul.msk.f32.gmra.mxu0 %vm180_vm2, %v63_v36  ;;  %590 = vmatmul.msk.f32.gmra.mxu1 %vm180_vm2, %v63_v36 }
 0x121   :  { %v211_v46 = vpop.f32.mrf.mxu0  ;;  %v234_v47 = vpop.f32.mrf.mxu1 }
 0x122   :  { %v212_v48 = vadd.f32 %v211_v46, %v173_v45  ;;  %v235_v49 = vadd.f32 %v234_v47, %v173_v45 }
 0x124   :  { %v577_v50 = vmul.f32 -1.442695, %v212_v48  ;;  %v578_v51 = vmul.f32 -1.442695, %v235_v49 }
 0x126   :  { %603 = vpow2.f32 %v577_v50 }
 0x127   :  { %605 = vpow2.f32 %v578_v51 }
 0x129   :  { %v214_v53 = vpop.f32.mrf.mxu0  ;;  %v237_v54 = vpop.f32.mrf.mxu1 }
 0x12a   :  { %v215_v55 = vadd.f32 %v214_v53, %v178_v52  ;;  %v238_v56 = vadd.f32 %v237_v54, %v178_v52 }
 0x12c   :  { %v604_v57 = vpop.eup %603  ;;  %v579_v58 = vmul.f32 -1.442695, %v215_v55  ;;  %v580_v61 = vmul.f32 -1.442695, %v238_v56 }
 0x12d   :  { %v606_v59 = vpop.eup %605  ;;  %v252_v60 = vadd.f32 1.0, %v604_v57 }
 0x12e   :  { %v253_v62 = vadd.f32 1.0, %v606_v59  ;;  %607 = vpow2.f32 %v579_v58 }
 0x12f   :  { %609 = vrcp.f32 %v252_v60  ;;  %v265_v13 = vand.u32 2147483647, %v252_v60  ;;  %v267_v15 = vand.u32 2147483648, %v252_v60  ;;  %vm261_vm4 = vweird.f32 %v252_v60 }
 0x130   :  { %611 = vrcp.f32 %v253_v62  ;;  %v282_v17 = vand.u32 2147483648, %v253_v62  ;;  %v280_v21 = vand.u32 2147483647, %v253_v62  ;;  %vm276_vm7 = vweird.f32 %v253_v62 }
 0x131   :  { %613 = vpow2.f32 %v580_v61  ;;  %v437_v63 = vpop.f32.mrf.mxu0  ;;  %v460_v0 = vpop.f32.mrf.mxu1  ;;  %vm266_vm6 = vcmp.eq.f32.partialorder %v265_v13, 8.507059e+37  ;;  %v268_v27 = vor.u32 1.1754944e-38, %v267_v15 }
 0x132   :  { %v438_v1 = vadd.f32 %v437_v63, %v173_v45  ;;  %v461_v2 = vadd.f32 %v460_v0, %v173_v45  ;;  %v283_v29 = vor.u32 1.1754944e-38, %v282_v17  ;;  %vm281_vm10 = vcmp.eq.f32.partialorder %v280_v21, 8.507059e+37 }
 0x134   :  { %v608_v3 = vpop.eup %607  ;;  %v591_v4 = vmul.f32 -1.442695, %v438_v1  ;;  %v592_v7 = vmul.f32 -1.442695, %v461_v2 }
 0x135   :  { %v610_v5 = vpop.eup %609  ;;  %v812_v6 = vadd.f32 1.0, %v608_v3 }
 0x136   :  { %v612_v8 = vpop.eup %611  ;;  %v257_v9 = vmul.f32 %v610_v5, %v252_v60  ;;  %615 = vpow2.f32 %v591_v4  ;;  %vm262_vm3 = vweird.f32 %v610_v5 }
 0x137   :  { %v614_v10 = vpop.eup %613  ;;  %v272_v11 = vmul.f32 %v612_v8, %v253_v62  ;;  %617 = vrcp.f32 %v812_v6  ;;  %vm277_vm5 = vweird.f32 %v612_v8  ;;  %vm263_vm8 = vmor %vm261_vm4, %vm262_vm3  ;;  %v297_v41 = vand.u32 2147483648, %v812_v6 }
 0x138   :  { %v258_v12 = vsub.f32 1.0, %v257_v9  ;;  %v815_v14 = vadd.f32 1.0, %v614_v10  ;;  %619 = vpow2.f32 %v592_v7  ;;  %vm278_vm9 = vmor %vm276_vm7, %vm277_vm5  ;;  %v295_v45 = vand.u32 2147483647, %v812_v6 }
 0x139   :  { %v273_v16 = vsub.f32 1.0, %v272_v11  ;;  %v440_v18 = vpop.f32.mrf.mxu0  ;;  %v463_v22 = vpop.f32.mrf.mxu1  ;;  %vm291_vm12 = vweird.f32 %v812_v6  ;;  %v298_v51 = vor.u32 1.1754944e-38, %v297_v41 }
 0x13a   :  { %v259_v19 = vmul.f32 %v610_v5, %v258_v12  ;;  %621 = vrcp.f32 %v815_v14  ;;  %v441_v25 = vadd.f32 %v440_v18, %v178_v52  ;;  %v464_v34 = vadd.f32 %v463_v22, %v178_v52 }
 0x13b   :  { %v274_v20 = vmul.f32 %v612_v8, %v273_v16  ;;  %v312_v49 = vand.u32 2147483648, %v815_v14  ;;  %v310_v53 = vand.u32 2147483647, %v815_v14  ;;  %vm296_vm15 = vcmp.eq.f32.partialorder %v295_v45, 8.507059e+37 }
 0x13c   :  { %v616_v23 = vpop.eup %615  ;;  %v260_v24 = vadd.f32 %v610_v5, %v259_v19  ;;  %v593_v33 = vmul.f32 -1.442695, %v441_v25  ;;  %v594_v46 = vmul.f32 -1.442695, %v464_v34  ;;  %vm306_vm0 = vweird.f32 %v815_v14 }
 0x13d   :  { %v618_v26 = vpop.eup %617  ;;  %v275_v28 = vadd.f32 %v612_v8, %v274_v20  ;;  %v818_v30 = vadd.f32 1.0, %v616_v23  ;;  %v313_v59 = vor.u32 1.1754944e-38, %v312_v49  ;;  %vm311_vm2 = vcmp.eq.f32.partialorder %v310_v53, 8.507059e+37 }
 0x13e   :  { %v264_v31 = vsel %vm263_vm8, %v610_v5, %v260_v24  ;;  %v287_v32 = vmul.f32 %v618_v26, %v812_v6  ;;  %v620_v35 = vpop.eup %619  ;;  %vm292_vm11 = vweird.f32 %v618_v26 }
 0x13f   :  { %v269_v36 = vsel %vm266_vm6, %v268_v27, %v264_v31  ;;  %v279_v37 = vsel %vm278_vm9, %v612_v8, %v275_v28  ;;  %623 = vrcp.f32 %v818_v30  ;;  %v825_v43 = vadd.f32 1.0, %v620_v35  ;;  %vm293_vm13 = vmor %vm291_vm12, %vm292_vm11 }
 0x140   :  { %v622_v38 = vpop.eup %621  ;;  %316 = vst [vmem:[#allocation7] sm:$0xff] %v269_v36  ;;  %v284_v39 = vsel %vm281_vm10, %v283_v29, %v279_v37  ;;  %v288_v40 = vsub.f32 1.0, %v287_v32  ;;  %625 = vpow2.f32 %v593_v33  ;;  %v491_v0 = vand.u32 2147483647, %v818_v30 }
 0x141   :  { %317 = vst [vmem:[#allocation7 + $0x8] sm:$0xff] %v284_v39  ;;  %v302_v42 = vmul.f32 %v622_v38, %v815_v14  ;;  %627 = vrcp.f32 %v825_v43  ;;  %vm307_vm14 = vweird.f32 %v622_v38  ;;  %v493_v1 = vand.u32 2147483648, %v818_v30 }
 0x142   :  { %v289_v44 = vmul.f32 %v618_v26, %v288_v40  ;;  %629 = vpow2.f32 %v594_v46  ;;  %vm308_vm1 = vmor %vm306_vm0, %vm307_vm14  ;;  %vm487_vm4 = vweird.f32 %v818_v30  ;;  %vm492_vm6 = vcmp.eq.f32.partialorder %v491_v0, 8.507059e+37 }
 0x143   :  { %v303_v47 = vsub.f32 1.0, %v302_v42  ;;  %v494_v9 = vor.u32 1.1754944e-38, %v493_v1  ;;  %v506_v10 = vand.u32 2147483647, %v825_v43  ;;  %v508_v11 = vand.u32 2147483648, %v825_v43 }
 0x144   :  { %v290_v48 = vadd.f32 %v618_v26, %v289_v44  ;;  %vm502_vm8 = vweird.f32 %v825_v43 }
 0x145   :  { %v624_v50 = vpop.eup %623  ;;  %v304_v52 = vmul.f32 %v622_v38, %v303_v47  ;;  %v509_v17 = vor.u32 1.1754944e-38, %v508_v11  ;;  %vm507_vm10 = vcmp.eq.f32.partialorder %v506_v10, 8.507059e+37 }
 0x146   :  { %v294_v54 = vsel %vm293_vm13, %v618_v26, %v290_v48  ;;  %v483_v55 = vmul.f32 %v624_v50, %v818_v30  ;;  %v626_v56 = vpop.eup %625  ;;  %vm488_vm3 = vweird.f32 %v624_v50 }
 0x147   :  { %v299_v57 = vsel %vm296_vm15, %v298_v51, %v294_v54  ;;  %v305_v58 = vadd.f32 %v622_v38, %v304_v52  ;;  %v480_v61 = vadd.f32 1.0, %v626_v56  ;;  %v628_v62 = vpop.eup %627  ;;  %vm489_vm5 = vmor %vm487_vm4, %vm488_vm3 }
 0x148   :  { %318 = vst [vmem:[#allocation7 + $0x10] sm:$0xff] %v299_v57  ;;  %v484_v60 = vsub.f32 1.0, %v483_v55  ;;  %v630_v2 = vpop.eup %629  ;;  %v498_v5 = vmul.f32 %v628_v62, %v825_v43  ;;  %vm503_vm7 = vweird.f32 %v628_v62 }
 0x149   :  { %v309_v63 = vsel %vm308_vm1, %v622_v38, %v305_v58  ;;  %631 = vrcp.f32 %v480_v61  ;;  %v481_v8 = vadd.f32 1.0, %v630_v2  ;;  %vm504_vm9 = vmor %vm502_vm8, %vm503_vm7  ;;  %v523_v23 = vand.u32 2147483648, %v480_v61 }
 0x14a   :  { %v314_v3 = vsel %vm311_vm2, %v313_v59, %v309_v63  ;;  %v485_v4 = vmul.f32 %v624_v50, %v484_v60  ;;  %v499_v7 = vsub.f32 1.0, %v498_v5  ;;  %v521_v26 = vand.u32 2147483647, %v480_v61 }
 0x14b   :  { %319 = vst [vmem:[#allocation7 + $0x18] sm:$0xff] %v314_v3  ;;  %633 = vrcp.f32 %v481_v8  ;;  %vm517_vm12 = vweird.f32 %v480_v61  ;;  %v538_v29 = vand.u32 2147483648, %v481_v8  ;;  %v524_v30 = vor.u32 1.1754944e-38, %v523_v23 }
 0x14c   :  { %v486_v6 = vadd.f32 %v624_v50, %v485_v4  ;;  %v500_v13 = vmul.f32 %v628_v62, %v499_v7  ;;  %v536_v32 = vand.u32 2147483647, %v481_v8  ;;  %vm522_vm15 = vcmp.eq.f32.partialorder %v521_v26, 8.507059e+37 }
 0x14d   :  { %vm532_vm0 = vweird.f32 %v481_v8  ;;  %v539_v36 = vor.u32 1.1754944e-38, %v538_v29 }
 0x14e   :  { %v490_v12 = vsel %vm489_vm5, %v624_v50, %v486_v6  ;;  %v501_v15 = vadd.f32 %v628_v62, %v500_v13  ;;  %vm537_vm2 = vcmp.eq.f32.partialorder %v536_v32, 8.507059e+37 }
 0x14f   :  { %v495_v14 = vsel %vm492_vm6, %v494_v9, %v490_v12  ;;  %v632_v16 = vpop.eup %631 }
 0x150   :  { %543 = vst [vmem:[#allocation7 + $0x20] sm:$0xff] %v495_v14  ;;  %v505_v18 = vsel %vm504_vm9, %v628_v62, %v501_v15  ;;  %v513_v19 = vmul.f32 %v632_v16, %v480_v61  ;;  %vm518_vm11 = vweird.f32 %v632_v16 }
 0x151   :  { %v510_v20 = vsel %vm507_vm10, %v509_v17, %v505_v18  ;;  %v634_v21 = vpop.eup %633  ;;  %vm519_vm13 = vmor %vm517_vm12, %vm518_vm11 }
 0x152   :  { %544 = vst [vmem:[#allocation7 + $0x28] sm:$0xff] %v510_v20  ;;  %v514_v22 = vsub.f32 1.0, %v513_v19  ;;  %v528_v24 = vmul.f32 %v634_v21, %v481_v8  ;;  %vm533_vm14 = vweird.f32 %v634_v21 }
 0x153   :  { %vm534_vm1 = vmor %vm532_vm0, %vm533_vm14 }
 0x154   :  { %v515_v25 = vmul.f32 %v632_v16, %v514_v22  ;;  %v529_v27 = vsub.f32 1.0, %v528_v24 }
 0x156   :  { %v516_v28 = vadd.f32 %v632_v16, %v515_v25  ;;  %v530_v31 = vmul.f32 %v634_v21, %v529_v27 }
 0x158   :  { %v520_v33 = vsel %vm519_vm13, %v632_v16, %v516_v28  ;;  %v531_v35 = vadd.f32 %v634_v21, %v530_v31 }
 0x159   :  { %v525_v34 = vsel %vm522_vm15, %v524_v30, %v520_v33 }
 0x15a   :  { %545 = vst [vmem:[#allocation7 + $0x30] sm:$0xff] %v525_v34  ;;  %v535_v37 = vsel %vm534_vm1, %v634_v21, %v531_v35 }
 0x15b   :  { %v540_v38 = vsel %vm537_vm2, %v539_v36, %v535_v37 }
 0x15c   :  { %546 = vst [vmem:[#allocation7 + $0x38] sm:$0xff] %v540_v38 }
 0x15d   :  { %559 = dma.vmem_to_hbm [thread:$0]  %s552_s21, 1024, %s554_s24, [#allocation4], %s714_s9, %s714_s9, %s715_s10  }
 0x15e   :  { %711 = dma.done.wait [#allocation4], 1024  }
 0x15f   :  { %712 = vsyncadd [#allocation4], 4294966272 }
 0x160   :  { %564 = vsyncpa [#allocation3], 1 }
 0x161   :  { %565 = vsyncpa [#allocation6], 1 }
 0x162   :  { %566 = vsyncpa [#allocation4], 1 }

</bundles_post_ra>
